<compile_context>
chip_gen: v7x
topology: tpu7x:2x2x1
jax: 0.10.0
libtpu: 0.0.40
codegen_flags: <defaults>
</compile_context>

<pallas_src>
import functools

import jax
import jax.numpy as jnp
from jax.experimental import pallas as pl
from jax.experimental.pallas import tpu as pltpu


def _round_up(x, m):
    return (x + m - 1) // m * m


def _pick_batch_tile(n, hw, k_p, c_p, vmem_budget_bytes=12 * 1024 * 1024):
    """Largest divisor of n whose block fits a conservative VMEM budget."""
    if hw % 8 != 0:
        # Keep merge/split reshapes inside the kernel layout-compatible.
        return 1
    # Per-sample bytes: double-buffered bf16 input block + f32 output block,
    # plus ~3 live f32 temporaries of (hw, c_p) inside the kernel.
    per_sample = hw * (2 * 2 * k_p + 2 * 4 * c_p + 3 * 4 * c_p)
    best = 1
    for bt in range(1, n + 1):
        if n % bt == 0 and bt * per_sample <= vmem_budget_bytes:
            best = bt
    return best


def _drs_conv_gn_kernel(x_ref, w_ref, b_ref, gamma_ref, beta_ref, m_ref, o_ref,
                        *, eps):
    """Fused (im2col) conv + per-sample GroupNorm for BT batch elements.

    x_ref:     (BT, H*W, K_p)       bf16 im2col slab (top/left zero-pad folded in)
    w_ref:     (K_p, C_out_p)       bf16 conv weight, tap-major rows, zero-padded
    b_ref:     (1, C_out_p)         f32 conv bias (zero on pad channels)
    gamma_ref: (1, C_out_p)         f32 GroupNorm weight (zero on pad channels)
    beta_ref:  (1, C_out_p)         f32 GroupNorm bias (zero on pad channels)
    m_ref:     (C_out_p, C_out_p)   f32 normalized group-membership matrix
    o_ref:     (BT, H*W, C_out_p)   f32 output
    """
    bt, hw, k_p = x_ref.shape
    c_p = o_ref.shape[-1]

    # --- conv: one lane-dense MXU matmul, bf16 operands, f32 accumulation ---
    x2 = x_ref[...].reshape(bt * hw, k_p)            # layout-compatible merge
    acc = jnp.dot(x2, w_ref[...], preferred_element_type=jnp.float32)
    acc = acc + b_ref[...]                           # (BT*HW, C_out_p)

    # --- GroupNorm stats: channels stay in lanes, no activation relayout ---
    acc3 = acc.reshape(bt, hw, c_p)                  # layout-compatible split
    s = jnp.sum(acc3, axis=1)                        # (BT, C_out_p)
    ss = jnp.sum(acc3 * acc3, axis=1)                # (BT, C_out_p)
    # Per-(sample, channel) group mean / E[x^2] via tiny matmul with the
    # normalized membership matrix (M[c, c'] = 1/(HW*Cpg) iff same group).
    mean = jnp.dot(s, m_ref[...], preferred_element_type=jnp.float32)
    ex2 = jnp.dot(ss, m_ref[...], preferred_element_type=jnp.float32)
    var = jnp.maximum(ex2 - mean * mean, 0.0)        # biased, as torch GroupNorm
    rstd = jax.lax.rsqrt(var + eps)

    scale = rstd * gamma_ref[...]                    # (BT, C_out_p)
    shift = beta_ref[...] - mean * scale             # (BT, C_out_p)
    o_ref[...] = (acc3 * scale[:, None, :] + shift[:, None, :]).astype(o_ref.dtype)


def down_right_shifted_conv2d(x_nchw, weight, bias, gamma, beta,
                              *, filter_size=(2, 2), eps=1e-6,
                              shift_output_right=False):
    """x_nchw: (N, C_in, H, W). weight: (C_out, C_in, KH, KW). Returns (N, C_out, H, W)."""
    N, C_in, H, W = x_nchw.shape
    C_out = weight.shape[0]
    KH, KW = filter_size

    assert C_out >= 4, "GroupNorm group count min(C_out//4, 32) requires C_out >= 4"
    G = min(C_out // 4, 32)
    assert C_out % G == 0, "C_out must be divisible by the GroupNorm group count"
    Cpg = C_out // G

    HW = H * W
    K = KH * KW * C_in
    K_p = _round_up(K, 8)             # sublane-align the contraction dim
    C_out_p = _round_up(C_out, 128)   # lane-dense output channels
    pad_c = C_out_p - C_out

    BT = _pick_batch_tile(N, HW, K_p, C_out_p)

    # ---- glue: layout + down/right zero-pad + im2col (single fused XLA pass) ----
    x = jnp.transpose(x_nchw, (0, 2, 3, 1))                              # NHWC
    x_pad = jnp.pad(x, ((0, 0), (KH - 1, 0), (KW - 1, 0), (0, 0)))
    taps = [x_pad[:, dh:dh + H, dw:dw + W, :]
            for dh in range(KH) for dw in range(KW)]
    x_col = jnp.concatenate(taps, axis=-1).reshape(N, HW, K)
    if K_p != K:
        x_col = jnp.pad(x_col, ((0, 0), (0, 0), (0, K_p - K)))
    x_col = x_col.astype(jnp.bfloat16)

    # weight -> (K, C_out) tap-major rows; zero-pad to (K_p, C_out_p); bf16.
    w_mat = jnp.transpose(weight, (2, 3, 1, 0)).reshape(K, C_out)
    w_mat = jnp.pad(w_mat, ((0, K_p - K), (0, pad_c))).astype(jnp.bfloat16)

    b2 = jnp.pad(bias.astype(jnp.float32), (0, pad_c)).reshape(1, C_out_p)
    g2 = jnp.pad(gamma.astype(jnp.float32), (0, pad_c)).reshape(1, C_out_p)
    be2 = jnp.pad(beta.astype(jnp.float32), (0, pad_c)).reshape(1, C_out_p)

    # Normalized group-membership matrix: M[c, c'] = 1/(H*W*Cpg) iff same group.
    # Pad channels fall into groups >= G (all-zero activations -> output 0).
    gid = jnp.arange(C_out_p) // Cpg
    m_norm = (gid[:, None] == gid[None, :]).astype(jnp.float32) / float(HW * Cpg)

    kernel = functools.partial(_drs_conv_gn_kernel, eps=eps)

    out_flat = pl.pallas_call(
        kernel,
        out_shape=jax.ShapeDtypeStruct((N, HW, C_out_p), jnp.float32),
        grid_spec=pltpu.PrefetchScalarGridSpec(
            num_scalar_prefetch=0,
            grid=(N // BT,),
            in_specs=[
                pl.BlockSpec((BT, HW, K_p), lambda n: (n, 0, 0)),
                pl.BlockSpec((K_p, C_out_p), lambda n: (0, 0)),
                pl.BlockSpec((1, C_out_p), lambda n: (0, 0)),
                pl.BlockSpec((1, C_out_p), lambda n: (0, 0)),
                pl.BlockSpec((1, C_out_p), lambda n: (0, 0)),
                pl.BlockSpec((C_out_p, C_out_p), lambda n: (0, 0)),
            ],
            out_specs=pl.BlockSpec((BT, HW, C_out_p), lambda n: (n, 0, 0)),
        ),
        # Sample blocks are independent -> parallel (sharded across v7x's 2 TCs).
        compiler_params=pltpu.CompilerParams(dimension_semantics=("parallel",)),
    )(x_col, w_mat, b2, g2, be2, m_norm)

    # TODO(synk): for very large H*W*C (v7x's 64 MiB VMEM), add an H-tiling grid
    # axis with a two-pass GroupNorm (accumulate per-group sum/sumsq in scratch)
    # instead of one whole-image block per grid step.

    out = out_flat[:, :, :C_out].reshape(N, H, W, C_out)
    out = jnp.transpose(out, (0, 3, 1, 2))   # back to NCHW (PyTorch interface)

    if shift_output_right:
        # right_shift: drop last width column, zero-pad one column on the left.
        out = jnp.pad(out[:, :, :, :-1], ((0, 0), (0, 0), (0, 0), (1, 0)))
    return out


def _reference(x_nchw, weight, bias, gamma, beta, *, filter_size=(2, 2),
               eps=1e-6, conv_dtype=jnp.float32):
    """Pure-JAX reference: pad + conv + GroupNorm (shift_output_right=False)."""
    KH, KW = filter_size
    C_out = weight.shape[0]
    G = min(C_out // 4, 32)
    y = jax.lax.conv_general_dilated(
        x_nchw.astype(conv_dtype), weight.astype(conv_dtype),
        window_strides=(1, 1), padding=((KH - 1, 0), (KW - 1, 0)),
        dimension_numbers=("NCHW", "OIHW", "NCHW"),
        preferred_element_type=jnp.float32)
    y = y + bias.astype(jnp.float32).reshape(1, C_out, 1, 1)
    N, C, H, W = y.shape
    yg = y.reshape(N, G, C // G, H, W)
    mean = jnp.mean(yg, axis=(2, 3, 4), keepdims=True)
    var = jnp.mean((yg - mean) ** 2, axis=(2, 3, 4), keepdims=True)
    yn = (yg - mean) * jax.lax.rsqrt(var + eps)
    yn = yn.reshape(N, C, H, W)
    return yn * gamma.reshape(1, C, 1, 1) + beta.reshape(1, C, 1, 1)


if __name__ == "__main__":
    key = jax.random.PRNGKey(0)
    k_x, k_w, k_b = jax.random.split(key, 3)

    N, C_in, H, W = 2, 4, 16, 16
    C_out = 8
    KH, KW = 2, 2

    x = jax.random.normal(k_x, (N, C_in, H, W), jnp.float32)

    # Deterministic parameter init (synthetic; mirrors PyTorch shapes).
    fan_in = C_in * KH * KW
    bound = 1.0 / (fan_in ** 0.5)
    weight = jax.random.uniform(k_w, (C_out, C_in, KH, KW), jnp.float32, -bound, bound)
    bias = jax.random.uniform(k_b, (C_out,), jnp.float32, -bound, bound)
    gamma = jnp.ones((C_out,), jnp.float32)   # GroupNorm default init
    beta = jnp.zeros((C_out,), jnp.float32)

    out = down_right_shifted_conv2d(x, weight, bias, gamma, beta,
                                    filter_size=(KH, KW), eps=1e-6,
                                    shift_output_right=False)
    out = jax.block_until_ready(out)
    assert out.shape == (N, C_out, H, W), out.shape

    # Tight check vs a reference that uses the same bf16 conv operands.
    ref_bf16 = _reference(x, weight, bias, gamma, beta, filter_size=(KH, KW),
                          eps=1e-6, conv_dtype=jnp.bfloat16)
    assert jnp.allclose(out, ref_bf16, atol=2e-3, rtol=2e-3), \
        "mismatch vs bf16-operand reference"

    # Loose sanity check vs the full-f32 reference (bf16 matmul operand error).
    ref_f32 = _reference(x, weight, bias, gamma, beta, filter_size=(KH, KW),
                         eps=1e-6, conv_dtype=jnp.float32)
    assert jnp.allclose(out, ref_f32, atol=5e-2, rtol=5e-2), \
        "mismatch vs f32 reference"

    print("KERNEL_OK")
</pallas_src>

<mosaic_0001>
module attributes {stable_mosaic.version = 11 : i64} {
  func.func @_drs_conv_gn_kernel(%arg0: i32, %arg1: memref<2x256x16xbf16, #tpu.memory_space<vmem>>, %arg2: memref<16x128xbf16, #tpu.memory_space<vmem>>, %arg3: memref<1x128xf32, #tpu.memory_space<vmem>>, %arg4: memref<1x128xf32, #tpu.memory_space<vmem>>, %arg5: memref<1x128xf32, #tpu.memory_space<vmem>>, %arg6: memref<128x128xf32, #tpu.memory_space<vmem>>, %arg7: memref<2x256x128xf32, #tpu.memory_space<vmem>>) attributes {dimension_semantics = [#tpu.dimension_semantics<parallel>], iteration_bounds = array<i64: 1>, scalar_prefetch = 0 : i64, scratch_operands = 0 : i64, tpu.core_type = #tpu.core_type<tc>, window_params = [{transform_indices = @transform_0, window_bounds = array<i64: 2, 256, 16>}, {pipeline_mode = #tpu.pipeline_mode<synchronous>, transform_indices = @transform_1, window_bounds = array<i64: 16, 128>}, {pipeline_mode = #tpu.pipeline_mode<synchronous>, transform_indices = @transform_2, window_bounds = array<i64: 1, 128>}, {pipeline_mode = #tpu.pipeline_mode<synchronous>, transform_indices = @transform_3, window_bounds = array<i64: 1, 128>}, {pipeline_mode = #tpu.pipeline_mode<synchronous>, transform_indices = @transform_4, window_bounds = array<i64: 1, 128>}, {pipeline_mode = #tpu.pipeline_mode<synchronous>, transform_indices = @transform_5, window_bounds = array<i64: 128, 128>}, {transform_indices = @transform_6, window_bounds = array<i64: 2, 256, 128>}]} {
    %c0 = arith.constant 0 : index
    %c0_0 = arith.constant 0 : index
    %c0_1 = arith.constant 0 : index
    %0 = vector.load %arg1[%c0, %c0_0, %c0_1] : memref<2x256x16xbf16, #tpu.memory_space<vmem>>, vector<2x256x16xbf16>
    %1 = vector.shape_cast %0 : vector<2x256x16xbf16> to vector<512x16xbf16>
    %c0_2 = arith.constant 0 : index
    %c0_3 = arith.constant 0 : index
    %2 = vector.load %arg2[%c0_2, %c0_3] : memref<16x128xbf16, #tpu.memory_space<vmem>>, vector<16x128xbf16>
    %cst = arith.constant dense<0.000000e+00> : vector<512x128xf32>
    %3 = tpu.matmul %1, %2, %cst {dimension_numbers = #tpu.dot_dimension_numbers<[1], [0], [0], [1], [0, 0, 1, 1], [], []>} : vector<512x16xbf16>, vector<16x128xbf16>, vector<512x128xf32> -> vector<512x128xf32>
    %c0_4 = arith.constant 0 : index
    %c0_5 = arith.constant 0 : index
    %4 = vector.load %arg3[%c0_4, %c0_5] : memref<1x128xf32, #tpu.memory_space<vmem>>, vector<1x128xf32>
    %5 = vector.broadcast %4 : vector<1x128xf32> to vector<512x128xf32>
    %6 = arith.addf %3, %5 : vector<512x128xf32>
    %7 = vector.shape_cast %6 : vector<512x128xf32> to vector<2x256x128xf32>
    %cst_6 = arith.constant dense<0.000000e+00> : vector<2x128xf32>
    %8 = vector.multi_reduction <add>, %7, %cst_6 [1] : vector<2x256x128xf32> to vector<2x128xf32>
    %9 = arith.mulf %7, %7 : vector<2x256x128xf32>
    %cst_7 = arith.constant dense<0.000000e+00> : vector<2x128xf32>
    %10 = vector.multi_reduction <add>, %9, %cst_7 [1] : vector<2x256x128xf32> to vector<2x128xf32>
    %c0_8 = arith.constant 0 : index
    %c0_9 = arith.constant 0 : index
    %11 = vector.load %arg6[%c0_8, %c0_9] : memref<128x128xf32, #tpu.memory_space<vmem>>, vector<128x128xf32>
    %cst_10 = arith.constant dense<0.000000e+00> : vector<2x128xf32>
    %12 = tpu.matmul %8, %11, %cst_10 {dimension_numbers = #tpu.dot_dimension_numbers<[1], [0], [0], [1], [0, 0, 1, 1], [], []>} : vector<2x128xf32>, vector<128x128xf32>, vector<2x128xf32> -> vector<2x128xf32>
    %c0_11 = arith.constant 0 : index
    %c0_12 = arith.constant 0 : index
    %13 = vector.load %arg6[%c0_11, %c0_12] : memref<128x128xf32, #tpu.memory_space<vmem>>, vector<128x128xf32>
    %cst_13 = arith.constant dense<0.000000e+00> : vector<2x128xf32>
    %14 = tpu.matmul %10, %13, %cst_13 {dimension_numbers = #tpu.dot_dimension_numbers<[1], [0], [0], [1], [0, 0, 1, 1], [], []>} : vector<2x128xf32>, vector<128x128xf32>, vector<2x128xf32> -> vector<2x128xf32>
    %15 = arith.mulf %12, %12 : vector<2x128xf32>
    %16 = arith.subf %14, %15 : vector<2x128xf32>
    %cst_14 = arith.constant 0.000000e+00 : f32
    %17 = vector.broadcast %cst_14 : f32 to vector<2x128xf32>
    %18 = arith.maximumf %16, %17 : vector<2x128xf32>
    %cst_15 = arith.constant 9.99999997E-7 : f32
    %19 = vector.broadcast %cst_15 : f32 to vector<2x128xf32>
    %20 = arith.addf %18, %19 : vector<2x128xf32>
    %21 = math.rsqrt %20 : vector<2x128xf32>
    %c0_16 = arith.constant 0 : index
    %c0_17 = arith.constant 0 : index
    %22 = vector.load %arg4[%c0_16, %c0_17] : memref<1x128xf32, #tpu.memory_space<vmem>>, vector<1x128xf32>
    %23 = vector.broadcast %22 : vector<1x128xf32> to vector<2x128xf32>
    %24 = arith.mulf %21, %23 : vector<2x128xf32>
    %c0_18 = arith.constant 0 : index
    %c0_19 = arith.constant 0 : index
    %25 = vector.load %arg5[%c0_18, %c0_19] : memref<1x128xf32, #tpu.memory_space<vmem>>, vector<1x128xf32>
    %26 = arith.mulf %12, %24 : vector<2x128xf32>
    %27 = vector.broadcast %25 : vector<1x128xf32> to vector<2x128xf32>
    %28 = arith.subf %27, %26 : vector<2x128xf32>
    %29 = vector.shape_cast %24 : vector<2x128xf32> to vector<2x1x128xf32>
    %30 = vector.broadcast %29 : vector<2x1x128xf32> to vector<2x256x128xf32>
    %31 = arith.mulf %7, %30 : vector<2x256x128xf32>
    %32 = vector.shape_cast %28 : vector<2x128xf32> to vector<2x1x128xf32>
    %33 = vector.broadcast %32 : vector<2x1x128xf32> to vector<2x256x128xf32>
    %34 = arith.addf %31, %33 : vector<2x256x128xf32>
    %c0_20 = arith.constant 0 : index
    %c0_21 = arith.constant 0 : index
    %c0_22 = arith.constant 0 : index
    %35 = vector.load %arg7[%c0_20, %c0_21, %c0_22] : memref<2x256x128xf32, #tpu.memory_space<vmem>>, vector<2x256x128xf32>
    tpu.vector_store %arg7[%c0_20, %c0_21, %c0_22], %34 {strides = array<i32>} : memref<2x256x128xf32, #tpu.memory_space<vmem>>, vector<2x256x128xf32>,
    return
  }
  func.func @transform_0(%arg0: i32) -> (i32, i32, i32) {
    %c0_i32 = arith.constant 0 : i32
    %c0_i32_0 = arith.constant 0 : i32
    %c0_i32_1 = arith.constant 0 : i32
    return %arg0, %c0_i32, %c0_i32_0 : i32, i32, i32
  }
  func.func @transform_1(%arg0: i32) -> (i32, i32) {
    %c0_i32 = arith.constant 0 : i32
    %c0_i32_0 = arith.constant 0 : i32
    %c0_i32_1 = arith.constant 0 : i32
    return %c0_i32, %c0_i32_0 : i32, i32
  }
  func.func @transform_2(%arg0: i32) -> (i32, i32) {
    %c0_i32 = arith.constant 0 : i32
    %c0_i32_0 = arith.constant 0 : i32
    %c0_i32_1 = arith.constant 0 : i32
    return %c0_i32, %c0_i32_0 : i32, i32
  }
  func.func @transform_3(%arg0: i32) -> (i32, i32) {
    %c0_i32 = arith.constant 0 : i32
    %c0_i32_0 = arith.constant 0 : i32
    %c0_i32_1 = arith.constant 0 : i32
    return %c0_i32, %c0_i32_0 : i32, i32
  }
  func.func @transform_4(%arg0: i32) -> (i32, i32) {
    %c0_i32 = arith.constant 0 : i32
    %c0_i32_0 = arith.constant 0 : i32
    %c0_i32_1 = arith.constant 0 : i32
    return %c0_i32, %c0_i32_0 : i32, i32
  }
  func.func @transform_5(%arg0: i32) -> (i32, i32) {
    %c0_i32 = arith.constant 0 : i32
    %c0_i32_0 = arith.constant 0 : i32
    %c0_i32_1 = arith.constant 0 : i32
    return %c0_i32, %c0_i32_0 : i32, i32
  }
  func.func @transform_6(%arg0: i32) -> (i32, i32, i32) {
    %c0_i32 = arith.constant 0 : i32
    %c0_i32_0 = arith.constant 0 : i32
    %c0_i32_1 = arith.constant 0 : i32
    return %arg0, %c0_i32, %c0_i32_0 : i32, i32, i32
  }
}

</mosaic_0001>

<bundles_post_ra>
// kernel: tpu_custom_call.1
= control target key start
LH: loop header
LB: loop body
LE: loop exit
PB: predicated region body
PF: predicated region fallthrough
CT: control target
= control target key end

     0   :  { %vm264_vm0 = vcmask 130048   ;;  %s2853_s0 = inlined_call_operand.vmem [shape: bf16[2,256,16], index: 0, kind: input, shape index: {}]   ;;  %s2854_s1 = inlined_call_operand.vmem [shape: bf16[16,128], index: 1, kind: input, shape index: {}]   ;;  %s2855_s2 = inlined_call_operand.vmem [shape: f32[1,128], index: 2, kind: input, shape index: {}]   ;;  %s2856_s3 = inlined_call_operand.vmem [shape: f32[1,128], index: 3, kind: input, shape index: {}]   ;;  %s2857_s4 = inlined_call_operand.vmem [shape: f32[1,128], index: 4, kind: input, shape index: {}]   ;;  %s2858_s5 = inlined_call_operand.vmem [shape: f32[128,128], index: 5, kind: input, shape index: {}]   ;;  %s2859_s6 = inlined_call_operand.hbm [shape: f32[2,256,128], index: 6, kind: output, shape index: {}]  }
   0x1   :  { %v1651_v0 = vld [vmem:[%s2854_s1] sm:$0xff]   ;;  %v1653_v2 = vld [vmem:[%s2853_s0 + $0x8] sm:$0xff]   ;;  %v1654_v3 = vld [vmem:[%s2853_s0 + $0x10] sm:$0xff]  }
   0x2   :  { %v1652_v1 = vld [vmem:[%s2853_s0] sm:$0xff]   ;;  %1458 = vmatprep.subr.bf16.mxu0 %v1651_v0  ;;  %1642 = vmatprep.subr.bf16.mxu1 %v1651_v0  ;;  %v1655_v4 = vld [vmem:[%s2853_s0 + $0x18] sm:$0xff]   ;;  %v1657_v6 = vld [vmem:[%s2853_s0 + $0x28] sm:$0xff]  }
   0x3   :  { %1459 = vmatpush3.bf16.msra.mxu0 %v1651_v0  ;;  %1460 = vmatprep.mubr.msk.bf16.mxu0 %vm264_vm0, %v1652_v1  ;;  %v1656_v5 = vld [vmem:[%s2853_s0 + $0x20] sm:$0xff]   ;;  %v1658_v7 = vld [vmem:[%s2853_s0 + $0x30] sm:$0xff]   ;;  %v1675_v9 = vld [vmem:[%s2853_s0 + $0xb8] sm:$0xff]  }
   0x4   :  { %1643 = vmatpush3.bf16.msra.mxu1 %v1651_v0  ;;  %v1674_v8 = vld [vmem:[%s2853_s0 + $0xb0] sm:$0xff]   ;;  %v1676_v10 = vld [vmem:[%s2853_s0 + $0xc0] sm:$0xff]   ;;  %v1659_v11 = vld [vmem:[%s2853_s0 + $0x38] sm:$0xff]  }
   0x5   :  { %1504 = vmatprep.mubr.msk.bf16.mxu1 %vm264_vm0, %v1674_v8  ;;  %v1660_v12 = vld [vmem:[%s2853_s0 + $0x40] sm:$0xff]   ;;  %v1677_v13 = vld [vmem:[%s2853_s0 + $0xc8] sm:$0xff]   ;;  %v1678_v14 = vld [vmem:[%s2853_s0 + $0xd0] sm:$0xff]  }
   0x6   :  { %1461 = vmatmul.mubr.msk.bf16.vlgmr.msra.gmra.mrb[0].mxu0 %vm264_vm0, %v1653_v2 }
   0x7   :  { %1464 = vmatprep.mubr.msk.bf16.mxu0 %vm264_vm0, %v1654_v3  ;;  %1505 = vmatmul.mubr.msk.bf16.vlgmr.msra.gmra.mrb[0].mxu1 %vm264_vm0, %v1675_v9 }
   0x8   :  { %1508 = vmatprep.mubr.msk.bf16.mxu1 %vm264_vm0, %v1676_v10 }
   0xe   :  { %1465 = vmatmul.mubr.msk.bf16.gmra.mrb[4].mxu0 %vm264_vm0, %v1655_v4 }
   0xf   :  { %1468 = vmatprep.mubr.msk.bf16.mxu0 %vm264_vm0, %v1656_v5 }
  0x16   :  { %1469 = vmatmul.mubr.msk.bf16.gmra.mrb[8].mxu0 %vm264_vm0, %v1657_v6 }
  0x17   :  { %1472 = vmatprep.mubr.msk.bf16.mxu0 %vm264_vm0, %v1658_v7 }
  0x1e   :  { %1473 = vmatmul.mubr.msk.bf16.gmra.mrb[12].mxu0 %vm264_vm0, %v1659_v11 }
  0x1f   :  { %1476 = vmatprep.mubr.msk.bf16.mxu0 %vm264_vm0, %v1660_v12 }
  0x20   :  { %11 = vsyncpa [#allocation3], 0  ;;  %v1661_v15 = vld [vmem:[%s2853_s0 + $0x48] sm:$0xff]   ;;  %1509 = vmatmul.mubr.msk.bf16.gmra.mrb[4].mxu1 %vm264_vm0, %v1677_v13  ;;  %v1662_v16 = vld [vmem:[%s2853_s0 + $0x50] sm:$0xff]   ;;  %v2860_v36 = vmov 0.0|0.0   ;;  %vm1711_vm1 = vmmov 0  }
  0x21   :  { %1512 = vmatprep.mubr.msk.bf16.mxu1 %vm264_vm0, %v1678_v14  ;;  %v1679_v17 = vld [vmem:[%s2853_s0 + $0xd8] sm:$0xff]   ;;  %v1680_v18 = vld [vmem:[%s2853_s0 + $0xe0] sm:$0xff]   ;;  %v1681_v21 = vld [vmem:[%s2853_s0 + $0xe8] sm:$0xff]   ;;  %1594 = vmatprep.subr.bf16.mxu1 %v2860_v36  ;;  %v2862_v7 = vmov 0.0   ;;  %vm880_vm2 = vcmask 1041409  }
  0x22   :  { %v1663_v19 = vld [vmem:[%s2853_s0 + $0x58] sm:$0xff]   ;;  %v1664_v20 = vld [vmem:[%s2853_s0 + $0x60] sm:$0xff]   ;;  %v1682_v22 = vld [vmem:[%s2853_s0 + $0xf0] sm:$0xff]  }
  0x23   :  { %v1665_v23 = vld [vmem:[%s2853_s0 + $0x68] sm:$0xff]   ;;  %v1666_v24 = vld [vmem:[%s2853_s0 + $0x70] sm:$0xff]   ;;  %v1683_v25 = vld [vmem:[%s2853_s0 + $0xf8] sm:$0xff]  }
  0x24   :  { %v1667_v26 = vld [vmem:[%s2853_s0 + $0x78] sm:$0xff]   ;;  %v1668_v27 = vld [vmem:[%s2853_s0 + $0x80] sm:$0xff]   ;;  %v1669_v28 = vld [vmem:[%s2853_s0 + $0x88] sm:$0xff]  }
  0x25   :  { %v1670_v29 = vld [vmem:[%s2853_s0 + $0x90] sm:$0xff]   ;;  %v1671_v30 = vld [vmem:[%s2853_s0 + $0x98] sm:$0xff]   ;;  %v1672_v31 = vld [vmem:[%s2853_s0 + $0xa0] sm:$0xff]  }
  0x26   :  { %1477 = vmatmul.mubr.msk.bf16.gmra.mrb[16].mxu0 %vm264_vm0, %v1661_v15  ;;  %v1673_v32 = vld [vmem:[%s2853_s0 + $0xa8] sm:$0xff]   ;;  %v862_v33 = vld [vmem:[%s2858_s5] sm:$0xff]  ;;  %v864_v37 = vld [vmem:[%s2858_s5 + $0x10] sm:$0xff] }
  0x27   :  { %1480 = vmatprep.mubr.msk.bf16.mxu0 %vm264_vm0, %v1662_v16  ;;  %v863_v34 = vld [vmem:[%s2858_s5 + $0x8] sm:$0xff]  ;;  %v865_v38 = vld [vmem:[%s2858_s5 + $0x18] sm:$0xff]  ;;  %v866_v40 = vld [vmem:[%s2858_s5 + $0x20] sm:$0xff] }
  0x28   :  { %1513 = vmatmul.mubr.msk.bf16.gmra.mrb[8].mxu1 %vm264_vm0, %v1679_v17  ;;  %v1889_v35 = vpack.c.bf16 %v863_v34, %v862_v33  ;;  %v1900_v39 = vpack.c.bf16 %v865_v38, %v864_v37  ;;  %v867_v41 = vld [vmem:[%s2858_s5 + $0x28] sm:$0xff]  ;;  %v868_v43 = vld [vmem:[%s2858_s5 + $0x30] sm:$0xff]  ;;  %v869_v44 = vld [vmem:[%s2858_s5 + $0x38] sm:$0xff] }
  0x29   :  { %1516 = vmatprep.mubr.msk.bf16.mxu1 %vm264_vm0, %v1680_v18  ;;  %v1910_v42 = vpack.c.bf16 %v867_v41, %v866_v40  ;;  %v1920_v45 = vpack.c.bf16 %v869_v44, %v868_v43  ;;  %v870_v46 = vld [vmem:[%s2858_s5 + $0x40] sm:$0xff]  ;;  %v871_v47 = vld [vmem:[%s2858_s5 + $0x48] sm:$0xff]  ;;  %v872_v53 = vld [vmem:[%s2858_s5 + $0x50] sm:$0xff] }
  0x2a   :  { %1596 = vmatpush3.bf16.msra.mxu1 %v1889_v35  ;;  %v1930_v48 = vpack.c.bf16 %v871_v47, %v870_v46  ;;  %v1935_v50 = vld [vmem:[%s2855_s2] ss:$0 sm:$0xff]  ;;  %v873_v54 = vld [vmem:[%s2858_s5 + $0x58] sm:$0xff]  ;;  %v875_v62 = vld [vmem:[%s2858_s5 + $0x68] sm:$0xff] }
  0x2b   :  { %1597 = vmatprep.subr.bf16.mxu1 %v2860_v36  ;;  %v1945_v56 = vpack.c.bf16 %v873_v54, %v872_v53  ;;  %v874_v61 = vld [vmem:[%s2858_s5 + $0x60] sm:$0xff]  ;;  %v876_v3 = vld [vmem:[%s2858_s5 + $0x70] sm:$0xff]  ;;  %v877_v4 = vld [vmem:[%s2858_s5 + $0x78] sm:$0xff] }
  0x2c   :  { %2894 = vst [vmem:[#allocation5_spill] sm:$0xff] %v1930_v48  ;;  %v1966_v63 = vpack.c.bf16 %v875_v62, %v874_v61  ;;  %v1979_v6 = vpack.c.bf16 %v877_v4, %v876_v3 }
  0x2d   :  { %2895 = vst [vmem:[#allocation6_spill] sm:$0xff] %v1945_v56 }
  0x2e   :  { %1481 = vmatmul.mubr.msk.bf16.gmra.mrb[20].mxu0 %vm264_vm0, %v1663_v19  ;;  %1599 = vmatpush3.bf16.msra.mxu1 %v1900_v39  ;;  %2899 = vst [vmem:[#allocation10_spill] sm:$0xff] %v1966_v63  ;;  %2901 = vst [vmem:[#allocation12_spill] sm:$0xff] %v1979_v6 }
  0x2f   :  { %1484 = vmatprep.mubr.msk.bf16.mxu0 %vm264_vm0, %v1664_v20  ;;  %1600 = vmatprep.subr.bf16.mxu1 %v2860_v36 }
  0x30   :  { %1517 = vmatmul.mubr.msk.bf16.gmra.mrb[12].mxu1 %vm264_vm0, %v1681_v21 }
  0x31   :  { %1520 = vmatprep.mubr.msk.bf16.mxu1 %vm264_vm0, %v1682_v22 }
  0x32   :  { %1602 = vmatpush3.bf16.msra.mxu1 %v1910_v42 }
  0x33   :  { %1603 = vmatprep.subr.bf16.mxu1 %v2860_v36 }
  0x36   :  { %1485 = vmatmul.mubr.msk.bf16.gmra.mrb[24].mxu0 %vm264_vm0, %v1665_v23  ;;  %1605 = vmatpush3.bf16.msra.mxu1 %v1920_v45 }
  0x37   :  { %1488 = vmatprep.mubr.msk.bf16.mxu0 %vm264_vm0, %v1666_v24  ;;  %1606 = vmatprep.subr.bf16.mxu1 %v2860_v36 }
  0x38   :  { %1521 = vmatmul.mubr.msk.bf16.gmra.mrb[16].mxu1 %vm264_vm0, %v1683_v25 }
  0x39   :  { %1556 = vmatprep.mubr.msk.f32.mxu1 %vm1711_vm1, %v2862_v7 }
  0x3a   :  { %1608 = vmatpush3.bf16.msra.mxu1 %v1930_v48 }
  0x3b   :  { %1609 = vmatprep.subr.bf16.mxu1 %v2860_v36 }
  0x3e   :  { %1489 = vmatmul.mubr.msk.bf16.gmra.mrb[28].mxu0 %vm264_vm0, %v1667_v26  ;;  %1611 = vmatpush3.bf16.msra.mxu1 %v1945_v56 }
  0x3f   :  { %1492 = vmatprep.mubr.msk.bf16.mxu0 %vm264_vm0, %v1668_v27  ;;  %1612 = vmatprep.subr.bf16.mxu1 %v2860_v36 }
  0x42   :  { %1614 = vmatpush3.bf16.msra.mxu1 %v1966_v63 }
  0x43   :  { %1615 = vmatprep.subr.bf16.mxu1 %v2860_v36 }
  0x46   :  { %1493 = vmatmul.mubr.msk.bf16.gmra.mrb[32].mxu0 %vm264_vm0, %v1669_v28  ;;  %1617 = vmatpush3.bf16.msra.mxu1 %v1979_v6 }
  0x47   :  { %1496 = vmatprep.mubr.msk.bf16.mxu0 %vm264_vm0, %v1670_v29  ;;  %1618 = vmatprep.subr.bf16.mxu1 %v2860_v36 }
  0x4e   :  { %1497 = vmatmul.mubr.msk.bf16.gmra.mrb[36].mxu0 %vm264_vm0, %v1671_v30 }
  0x4f   :  { %1500 = vmatprep.mubr.msk.bf16.mxu0 %vm264_vm0, %v1672_v31 }
  0x56   :  { %1501 = vmatmul.mubr.msk.bf16.gmra.mrb[40].mxu0 %vm264_vm0, %v1673_v32 }
  0xd9   :  { %v1462_v49 = vpop.f32.mrb[0].mxu0 }
  0xda   :  { %v395_v51 = vpop.f32.mrb[1].mxu0  ;;  %v1955_v59 = vadd.f32 %v1462_v49, %v1935_v50  ;;  %v2002_v22 = vpop.f32.mrb[0].mxu1 }
  0xdb   :  { %v1463_v52 = vpop.f32.mrb[2].mxu0  ;;  %v1948_v57 = vadd.f32 %v1935_v50, %v395_v51  ;;  %v2008_v25 = vpop.f32.mrb[1].mxu1 }
  0xdc   :  { %v398_v55 = vpop.f32.mrb[3].mxu0  ;;  %2898 = vst [vmem:[#allocation9_spill] sm:$0xff] %v1955_v59  ;;  %v1969_v0 = vadd.f32 %v1463_v52, %v1935_v50  ;;  %v2010_v26 = vpop.f32.mrb[2].mxu1  ;;  %v726_v46 = vmul.f32 %v1955_v59, %v1955_v59 }
  0xdd   :  { %2896 = vst [vmem:[#allocation7_spill] sm:$0xff] %v1948_v57  ;;  %v1951_v58 = vadd.f32 %v1935_v50, %v398_v55  ;;  %v2012_v27 = vpop.f32.mrb[3].mxu1  ;;  %v724_v34 = vmul.f32 %v1948_v57, %v1948_v57 }
  0xde   :  { %2900 = vst [vmem:[#allocation11_spill] sm:$0xff] %v1969_v0 }
  0xdf   :  { %2897 = vst [vmem:[#allocation8_spill] sm:$0xff] %v1951_v58  ;;  %v650_v60 = vadd.f32 %v1951_v58, %v1948_v57  ;;  %v725_v29 = vmul.f32 %v1951_v58, %v1951_v58 }
  0xe1   :  { %v651_v1 = vadd.f32 %v650_v60, %v1955_v59  ;;  %v1466_v2 = vpop.f32.mrb[4].mxu0  ;;  %v788_v40 = vadd.f32 %v725_v29, %v724_v34  ;;  %v727_v60 = vmul.f32 %v1969_v0, %v1969_v0 }
  0xe2   :  { %v411_v5 = vpop.f32.mrb[5].mxu0  ;;  %v1996_v15 = vadd.f32 %v1466_v2, %v1935_v50 }
  0xe3   :  { %v1984_v8 = vadd.f32 %v1935_v50, %v411_v5  ;;  %v652_v9 = vadd.f32 %v651_v1, %v1969_v0  ;;  %v1467_v10 = vpop.f32.mrb[6].mxu0  ;;  %v789_v52 = vadd.f32 %v788_v40, %v726_v46 }
  0xe4   :  { %v414_v11 = vpop.f32.mrb[7].mxu0  ;;  %2904 = vst [vmem:[#allocation15_spill] sm:$0xff] %v1996_v15  ;;  %v2000_v20 = vadd.f32 %v1467_v10, %v1935_v50 }
  0xe5   :  { %2902 = vst [vmem:[#allocation13_spill] sm:$0xff] %v1984_v8  ;;  %v653_v12 = vadd.f32 %v652_v9, %v1984_v8  ;;  %v1990_v13 = vadd.f32 %v1935_v50, %v414_v11  ;;  %v728_v2 = vmul.f32 %v1984_v8, %v1984_v8  ;;  %v790_v3 = vadd.f32 %v789_v52, %v727_v60 }
  0xe6   :  { %2905 = vst [vmem:[#allocation16_spill] sm:$0xff] %v2000_v20 }
  0xe7   :  { %2903 = vst [vmem:[#allocation14_spill] sm:$0xff] %v1990_v13  ;;  %v654_v14 = vadd.f32 %v653_v12, %v1990_v13 }
  0xe9   :  { %v1470_v16 = vpop.f32.mrb[8].mxu0  ;;  %v655_v17 = vadd.f32 %v654_v14, %v1996_v15  ;;  %v791_v14 = vadd.f32 %v790_v3, %v728_v2 }
  0xea   :  { %v427_v18 = vpop.f32.mrb[9].mxu0  ;;  %v2032_v47 = vadd.f32 %v1470_v16, %v1935_v50  ;;  %v729_v16 = vmul.f32 %v1990_v13, %v1990_v13 }
  0xeb   :  { %v1471_v19 = vpop.f32.mrb[10].mxu0  ;;  %v2005_v23 = vadd.f32 %v1935_v50, %v427_v18  ;;  %v656_v24 = vadd.f32 %v655_v17, %v2000_v20 }
  0xec   :  { %v430_v21 = vpop.f32.mrb[11].mxu0  ;;  %2908 = vst [vmem:[#allocation19_spill] sm:$0xff] %v2032_v47  ;;  %v2042_v61 = vadd.f32 %v1471_v19, %v1935_v50 }
  0xed   :  { %2906 = vst [vmem:[#allocation17_spill] sm:$0xff] %v2005_v23  ;;  %v657_v30 = vadd.f32 %v656_v24, %v2005_v23  ;;  %v2018_v31 = vadd.f32 %v1935_v50, %v430_v21 }
  0xee   :  { %2909 = vst [vmem:[#allocation20_spill] sm:$0xff] %v2042_v61 }
  0xef   :  { %2907 = vst [vmem:[#allocation18_spill] sm:$0xff] %v2018_v31  ;;  %v658_v41 = vadd.f32 %v657_v30, %v2018_v31  ;;  %v792_v30 = vadd.f32 %v791_v14, %v729_v16  ;;  %v733_v13 = vmul.f32 %v2018_v31, %v2018_v31 }
  0xf1   :  { %v1474_v28 = vpop.f32.mrb[12].mxu0  ;;  %v659_v53 = vadd.f32 %v658_v41, %v2032_v47  ;;  %v730_v41 = vmul.f32 %v1996_v15, %v1996_v15 }
  0xf2   :  { %v443_v32 = vpop.f32.mrb[13].mxu0 }
  0xf3   :  { %v1475_v33 = vpop.f32.mrb[14].mxu0  ;;  %v2022_v38 = vpop.f32.mrb[4].mxu1  ;;  %v2049_v4 = vadd.f32 %v1935_v50, %v443_v32  ;;  %v660_v5 = vadd.f32 %v659_v53, %v2042_v61  ;;  %v793_v53 = vadd.f32 %v792_v30, %v730_v41 }
  0xf4   :  { %v446_v37 = vpop.f32.mrb[15].mxu0  ;;  %v2025_v43 = vpop.f32.mrb[5].mxu1  ;;  %v2094_v14 = vadd.f32 %v1475_v33, %v1935_v50 }
  0xf5   :  { %v2027_v44 = vpop.f32.mrb[6].mxu1  ;;  %2910 = vst [vmem:[#allocation21_spill] sm:$0xff] %v2049_v4  ;;  %v661_v17 = vadd.f32 %v660_v5, %v2049_v4  ;;  %v2064_v18 = vadd.f32 %v1935_v50, %v446_v37  ;;  %v2080_v37 = vadd.f32 %v1474_v28, %v1935_v50  ;;  %v731_v5 = vmul.f32 %v2000_v20, %v2000_v20 }
  0xf6   :  { %v2034_v49 = vpop.f32.mrb[7].mxu1 }
  0xf7   :  { %v662_v32 = vadd.f32 %v661_v17, %v2064_v18  ;;  %2911 = vst [vmem:[#allocation22_spill] sm:$0xff] %v2080_v37  ;;  %v732_v17 = vmul.f32 %v2005_v23, %v2005_v23  ;;  %v794_v30 = vadd.f32 %v793_v53, %v731_v5  ;;  %v737_v6 = vmul.f32 %v2064_v18, %v2064_v18 }
  0xf9   :  { %v1478_v51 = vpop.f32.mrb[16].mxu0  ;;  %v663_v60 = vadd.f32 %v662_v32, %v2080_v37  ;;  %v795_v15 = vadd.f32 %v794_v30, %v732_v17  ;;  %v734_v17 = vmul.f32 %v2032_v47, %v2032_v47 }
  0xfa   :  { %v459_v54 = vpop.f32.mrb[17].mxu0  ;;  %v2130_v30 = vadd.f32 %v1478_v51, %v1935_v50 }
  0xfb   :  { %v2037_v55 = vpop.f32.mrb[18].mxu0  ;;  %v2044_v1 = vpop.f32.mrb[8].mxu1  ;;  %v2103_v32 = vadd.f32 %v1935_v50, %v459_v54  ;;  %v664_v41 = vadd.f32 %v663_v60, %v2094_v14  ;;  %v796_v8 = vadd.f32 %v795_v15, %v733_v13  ;;  %v735_v13 = vmul.f32 %v2042_v61, %v2042_v61 }
  0xfc   :  { %v462_v62 = vpop.f32.mrb[19].mxu0  ;;  %v2052_v9 = vpop.f32.mrb[9].mxu1  ;;  %v2140_v15 = vadd.f32 %v2037_v55, %v1935_v50 }
  0xfd   :  { %v2054_v10 = vpop.f32.mrb[10].mxu1  ;;  %v665_v23 = vadd.f32 %v664_v41, %v2103_v32  ;;  %v2118_v53 = vadd.f32 %v1935_v50, %v462_v62  ;;  %v797_v41 = vadd.f32 %v796_v8, %v734_v17 }
  0xfe   :  { %v2056_v11 = vpop.f32.mrb[11].mxu1 }
  0xff   :  { %v666_v0 = vadd.f32 %v665_v23, %v2118_v53 }
 0x101   :  { %v2058_v12 = vpop.f32.mrb[20].mxu0  ;;  %v667_v62 = vadd.f32 %v666_v0, %v2130_v30  ;;  %v736_v0 = vmul.f32 %v2049_v4, %v2049_v4 }
 0x102   :  { %v475_v19 = vpop.f32.mrb[21].mxu0 }
 0x103   :  { %v2066_v21 = vpop.f32.mrb[22].mxu0  ;;  %v2070_v29 = vpop.f32.mrb[12].mxu1  ;;  %v2151_v17 = vadd.f32 %v1935_v50, %v475_v19  ;;  %v668_v61 = vadd.f32 %v667_v62, %v2140_v15 }
 0x104   :  { %v2068_v24 = vpop.f32.mrb[23].mxu0  ;;  %v2073_v34 = vpop.f32.mrb[13].mxu1 }
 0x105   :  { %v2075_v40 = vpop.f32.mrb[14].mxu1  ;;  %v2171_v63 = vadd.f32 %v1935_v50, %v2068_v24 }
 0x106   :  { %v2082_v46 = vpop.f32.mrb[15].mxu1 }
 0x109   :  { %v2084_v52 = vpop.f32.mrb[24].mxu0 }
 0x10a   :  { %v2087_v2 = vpop.f32.mrb[25].mxu0 }
 0x10b   :  { %v2089_v3 = vpop.f32.mrb[26].mxu0  ;;  %v2098_v28 = vpop.f32.mrb[16].mxu1 }
 0x10c   :  { %v2096_v16 = vpop.f32.mrb[27].mxu0  ;;  %v2106_v36 = vpop.f32.mrb[17].mxu1 }
 0x10d   :  { %v2108_v7 = vpop.f32.mrb[18].mxu1 }
 0x10e   :  { %v2110_v20 = vpop.f32.mrb[19].mxu1 }
 0x111   :  { %v2112_v33 = vpop.f32.mrb[28].mxu0 }
 0x112   :  { %v2120_v54 = vpop.f32.mrb[29].mxu0 }
 0x113   :  { %v2122_v60 = vpop.f32.mrb[30].mxu0 }
 0x114   :  { %v2124_v5 = vpop.f32.mrb[31].mxu0 }
 0x119   :  { %v1494_v31 = vpop.f32.mrb[32].mxu0 }
 0x11a   :  { %v523_v59 = vpop.f32.mrb[33].mxu0  ;;  %v2143_v51 = vadd.f32 %v1494_v31, %v1935_v50 }
 0x11b   :  { %v2134_v58 = vadd.f32 %v1935_v50, %v523_v59  ;;  %v1495_v57 = vpop.f32.mrb[34].mxu0  ;;  %v798_v59 = vadd.f32 %v797_v41, %v735_v13 }
 0x11c   :  { %v526_v23 = vpop.f32.mrb[35].mxu0  ;;  %2913 = vst [vmem:[#allocation24_spill] sm:$0xff] %v2143_v51  ;;  %v2157_v47 = vadd.f32 %v1495_v57, %v1935_v50  ;;  %v758_v41 = vmul.f32 %v2143_v51, %v2143_v51  ;;  %v669_v57 = vadd.f32 %v668_v61, %v2151_v17 }
 0x11d   :  { %2912 = vst [vmem:[#allocation23_spill] sm:$0xff] %v2134_v58  ;;  %v2146_v8 = vadd.f32 %v1935_v50, %v526_v23  ;;  %v756_v55 = vmul.f32 %v2134_v58, %v2134_v58  ;;  %v799_v62 = vadd.f32 %v798_v59, %v736_v0 }
 0x11e   :  { %2915 = vst [vmem:[#allocation26_spill] sm:$0xff] %v2157_v47 }
 0x11f   :  { %2914 = vst [vmem:[#allocation25_spill] sm:$0xff] %v2146_v8  ;;  %v687_v31 = vadd.f32 %v2146_v8, %v2134_v58  ;;  %v757_v23 = vmul.f32 %v2146_v8, %v2146_v8  ;;  %v759_v8 = vmul.f32 %v2157_v47, %v2157_v47 }
 0x121   :  { %v688_v19 = vadd.f32 %v687_v31, %v2143_v51  ;;  %v825_v13 = vadd.f32 %v757_v23, %v756_v55  ;;  %v1498_v4 = vpop.f32.mrb[36].mxu0 }
 0x122   :  { %v539_v58 = vpop.f32.mrb[37].mxu0  ;;  %v2180_v59 = vadd.f32 %v1498_v4, %v1935_v50 }
 0x123   :  { %v826_v56 = vadd.f32 %v825_v13, %v758_v41  ;;  %v2176_v48 = vadd.f32 %v1935_v50, %v539_v58  ;;  %v689_v55 = vadd.f32 %v688_v19, %v2157_v47  ;;  %v1499_v0 = vpop.f32.mrb[38].mxu0  ;;  %v800_v41 = vadd.f32 %v799_v62, %v737_v6 }
 0x124   :  { %v542_v31 = vpop.f32.mrb[39].mxu0  ;;  %v670_v58 = vadd.f32 %v669_v57, %v2171_v63  ;;  %v2190_v19 = vadd.f32 %v1499_v0, %v1935_v50  ;;  %v762_v6 = vmul.f32 %v2180_v59, %v2180_v59 }
 0x125   :  { %2916 = vst [vmem:[#allocation27_spill] sm:$0xff] %v2176_v48  ;;  %v690_v61 = vadd.f32 %v689_v55, %v2176_v48  ;;  %v760_v24 = vmul.f32 %v2176_v48, %v2176_v48  ;;  %v827_v23 = vadd.f32 %v826_v56, %v759_v8  ;;  %v2186_v51 = vadd.f32 %v1935_v50, %v542_v31 }
 0x126   :  { %v738_v55 = vmul.f32 %v2080_v37, %v2080_v37  ;;  %v2199_v56 = vadd.f32 %v2058_v12, %v1935_v50  ;;  %v739_v37 = vmul.f32 %v2094_v14, %v2094_v14 }
 0x127   :  { %2917 = vst [vmem:[#allocation28_spill] sm:$0xff] %v2186_v51  ;;  %v828_v13 = vadd.f32 %v827_v23, %v760_v24  ;;  %v691_v4 = vadd.f32 %v690_v61, %v2186_v51  ;;  %v761_v47 = vmul.f32 %v2186_v51, %v2186_v51  ;;  %v763_v24 = vmul.f32 %v2190_v19, %v2190_v19 }
 0x128   :  { %v801_v0 = vadd.f32 %v800_v41, %v738_v55  ;;  %v671_v31 = vadd.f32 %v670_v58, %v2199_v56 }
 0x129   :  { %v692_v8 = vadd.f32 %v691_v4, %v2180_v59  ;;  %v829_v62 = vadd.f32 %v828_v13, %v761_v47  ;;  %v1502_v57 = vpop.f32.mrb[40].mxu0  ;;  %v2215_v47 = vadd.f32 %v2066_v21, %v1935_v50  ;;  %v2222_v13 = vadd.f32 %v1935_v50, %v2008_v25 }
 0x12a   :  { %v555_v61 = vpop.f32.mrb[41].mxu0  ;;  %v2218_v41 = vadd.f32 %v1502_v57, %v1935_v50  ;;  %v740_v21 = vmul.f32 %v2103_v32, %v2103_v32  ;;  %v2234_v57 = vadd.f32 %v1935_v50, %v2087_v2 }
 0x12b   :  { %v830_v23 = vadd.f32 %v829_v62, %v762_v6  ;;  %v2208_v51 = vadd.f32 %v1935_v50, %v555_v61  ;;  %v693_v12 = vadd.f32 %v692_v8, %v2190_v19  ;;  %v1503_v48 = vpop.f32.mrb[42].mxu0  ;;  %v802_v62 = vadd.f32 %v801_v0, %v739_v37 }
 0x12c   :  { %2919 = vst [vmem:[#allocation30_spill] sm:$0xff] %v2218_v41  ;;  %v558_v58 = vpop.f32.mrb[43].mxu0  ;;  %v672_v25 = vadd.f32 %v671_v31, %v2215_v47  ;;  %v768_v2 = vmul.f32 %v2222_v13, %v2222_v13  ;;  %v741_v31 = vmul.f32 %v2118_v53, %v2118_v53 }
 0x12d   :  { %2918 = vst [vmem:[#allocation29_spill] sm:$0xff] %v2208_v51  ;;  %v694_v4 = vadd.f32 %v693_v12, %v2208_v51  ;;  %v764_v55 = vmul.f32 %v2208_v51, %v2208_v51  ;;  %v831_v6 = vadd.f32 %v830_v23, %v763_v24  ;;  %v2228_v8 = vadd.f32 %v1935_v50, %v558_v58 }
 0x12e   :  { %v2238_v12 = vadd.f32 %v1503_v48, %v1935_v50  ;;  %v766_v23 = vmul.f32 %v2218_v41, %v2218_v41  ;;  %v803_v58 = vadd.f32 %v802_v62, %v740_v21  ;;  %v673_v48 = vadd.f32 %v672_v25, %v2234_v57 }
 0x12f   :  { %v832_v61 = vadd.f32 %v831_v6, %v764_v55  ;;  %v695_v51 = vadd.f32 %v694_v4, %v2228_v8  ;;  %v765_v24 = vmul.f32 %v2228_v8, %v2228_v8  ;;  %v2253_v4 = vadd.f32 %v1935_v50, %v2012_v27 }
 0x130   :  { %v2257_v55 = vadd.f32 %v1935_v50, %v2096_v16  ;;  %v2264_v21 = vadd.f32 %v2002_v22, %v1935_v50  ;;  %v2269_v27 = vadd.f32 %v2010_v26, %v1935_v50  ;;  %v2277_v22 = vadd.f32 %v1935_v50, %v2025_v43 }
 0x131   :  { %v696_v37 = vadd.f32 %v695_v51, %v2218_v41  ;;  %v833_v0 = vadd.f32 %v832_v61, %v765_v24  ;;  %v767_v51 = vmul.f32 %v2238_v12, %v2238_v12  ;;  %v804_v24 = vadd.f32 %v803_v58, %v741_v31 }
 0x132   :  { %v769_v16 = vmul.f32 %v2253_v4, %v2253_v4  ;;  %v674_v41 = vadd.f32 %v673_v48, %v2257_v55  ;;  %v2283_v58 = vadd.f32 %v2084_v52, %v1935_v50  ;;  %v770_v26 = vmul.f32 %v2264_v21, %v2264_v21 }
 0x133   :  { %v834_v6 = vadd.f32 %v833_v0, %v766_v23  ;;  %v697_v61 = vadd.f32 %v696_v37, %v2238_v12  ;;  %v742_v0 = vmul.f32 %v2130_v30, %v2130_v30  ;;  %v2292_v43 = vadd.f32 %v1935_v50, %v2034_v49 }
 0x135   :  { %v698_v62 = vadd.f32 %v697_v61, %v2222_v13  ;;  %v835_v25 = vadd.f32 %v834_v6, %v767_v51  ;;  %v771_v51 = vmul.f32 %v2269_v27, %v2269_v27  ;;  %v675_v6 = vadd.f32 %v674_v41, %v2283_v58 }
 0x137   :  { %v836_v23 = vadd.f32 %v835_v25, %v768_v2  ;;  %v699_v37 = vadd.f32 %v698_v62, %v2253_v4  ;;  %v805_v2 = vadd.f32 %v804_v24, %v742_v0  ;;  %v772_v62 = vmul.f32 %v2277_v22, %v2277_v22 }
 0x138   :  { %v743_v25 = vmul.f32 %v2140_v15, %v2140_v15  ;;  %v2302_v24 = vadd.f32 %v2022_v38, %v1935_v50  ;;  %v2319_v38 = vadd.f32 %v1935_v50, %v2052_v9 }
 0x139   :  { %v700_v31 = vadd.f32 %v699_v37, %v2264_v21  ;;  %v837_v48 = vadd.f32 %v836_v23, %v769_v16  ;;  %v2306_v16 = vadd.f32 %v2089_v3, %v1935_v50  ;;  %v2311_v23 = vadd.f32 %v2027_v44, %v1935_v50 }
 0x13a   :  { %v744_v37 = vmul.f32 %v2151_v17, %v2151_v17  ;;  %v806_v0 = vadd.f32 %v805_v2, %v743_v25  ;;  %v2323_v3 = vadd.f32 %v1935_v50, %v2120_v54  ;;  %v745_v25 = vmul.f32 %v2171_v63, %v2171_v63 }
 0x13b   :  { %v838_v61 = vadd.f32 %v837_v48, %v770_v26  ;;  %v701_v52 = vadd.f32 %v700_v31, %v2269_v27  ;;  %v773_v26 = vmul.f32 %v2292_v43, %v2292_v43  ;;  %v676_v31 = vadd.f32 %v675_v6, %v2306_v16 }
 0x13c   :  { %v775_v2 = vmul.f32 %v2311_v23, %v2311_v23  ;;  %v807_v9 = vadd.f32 %v806_v0, %v744_v37  ;;  %v776_v54 = vmul.f32 %v2319_v38, %v2319_v38  ;;  %v2338_v6 = vadd.f32 %v1935_v50, %v2056_v11 }
 0x13d   :  { %v702_v49 = vadd.f32 %v701_v52, %v2277_v22  ;;  %v839_v41 = vadd.f32 %v838_v61, %v771_v51  ;;  %v774_v51 = vmul.f32 %v2302_v24, %v2302_v24  ;;  %v2348_v37 = vadd.f32 %v2044_v1, %v1935_v50 }
 0x13e   :  { %v2353_v11 = vadd.f32 %v2054_v10, %v1935_v50  ;;  %v746_v10 = vmul.f32 %v2199_v56, %v2199_v56 }
 0x13f   :  { %v840_v48 = vadd.f32 %v839_v41, %v772_v62  ;;  %v703_v44 = vadd.f32 %v702_v49, %v2292_v43  ;;  %v677_v62 = vadd.f32 %v676_v31, %v2323_v3  ;;  %v2343_v49 = vadd.f32 %v1935_v50, %v2124_v5 }
 0x140   :  { %v777_v31 = vmul.f32 %v2338_v6, %v2338_v6  ;;  %v778_v1 = vmul.f32 %v2348_v37, %v2348_v37 }
 0x141   :  { %v704_v61 = vadd.f32 %v703_v44, %v2302_v24  ;;  %v841_v52 = vadd.f32 %v840_v48, %v773_v26  ;;  %v808_v44 = vadd.f32 %v807_v9, %v745_v25  ;;  %v678_v5 = vadd.f32 %v677_v62, %v2343_v49 }
 0x143   :  { %v842_v41 = vadd.f32 %v841_v52, %v774_v51  ;;  %v705_v26 = vadd.f32 %v704_v61, %v2311_v23  ;;  %v2363_v52 = vadd.f32 %v1935_v50, %v2073_v34  ;;  %v809_v62 = vadd.f32 %v808_v44, %v746_v10 }
 0x144   :  { %v2387_v44 = vadd.f32 %v1935_v50, %v2082_v46 }
 0x145   :  { %v706_v0 = vadd.f32 %v705_v26, %v2319_v38  ;;  %v843_v48 = vadd.f32 %v842_v41, %v775_v2  ;;  %v2369_v2 = vadd.f32 %v2112_v33, %v1935_v50  ;;  %v2382_v33 = vadd.f32 %v2122_v60, %v1935_v50 }
 0x146   :  { %2920 = vst [vmem:[#allocation31_spill] sm:$0xff] %v2387_v44 }
 0x147   :  { %v844_v51 = vadd.f32 %v843_v48, %v776_v54  ;;  %v707_v61 = vadd.f32 %v706_v0, %v2338_v6  ;;  %v779_v54 = vmul.f32 %v2353_v11, %v2353_v11  ;;  %v679_v41 = vadd.f32 %v678_v5, %v2369_v2 }
 0x148   :  { %v747_v0 = vmul.f32 %v2215_v47, %v2215_v47  ;;  %v780_v48 = vmul.f32 %v2363_v52, %v2363_v52  ;;  %v2391_v5 = vadd.f32 %v2070_v29, %v1935_v50  ;;  %v781_v29 = vmul.f32 %v2387_v44, %v2387_v44 }
 0x149   :  { %v708_v9 = vadd.f32 %v707_v61, %v2348_v37  ;;  %v845_v25 = vadd.f32 %v844_v51, %v777_v31  ;;  %v748_v61 = vmul.f32 %v2234_v57, %v2234_v57  ;;  %v680_v10 = vadd.f32 %v679_v41, %v2382_v33 }
 0x14a   :  { %2921 = vst [vmem:[#allocation32_spill] sm:$0xff] %v2391_v5 }
 0x14b   :  { %v846_v26 = vadd.f32 %v845_v25, %v778_v1  ;;  %v709_v34 = vadd.f32 %v708_v9, %v2353_v11  ;;  %v810_v1 = vadd.f32 %v809_v62, %v747_v0  ;;  %v2399_v25 = vadd.f32 %v2075_v40, %v1935_v50 }
 0x14c   :  { %v749_v62 = vmul.f32 %v2257_v55, %v2257_v55  ;;  %v681_v41 = vrot.slane %v680_v10, 4 }
 0x14d   :  { %v710_v31 = vadd.f32 %v709_v34, %v2363_v52  ;;  %v847_v51 = vadd.f32 %v846_v26, %v779_v54  ;;  %2922 = vst [vmem:[#allocation33_spill] sm:$0xff] %v2399_v25  ;;  %v2404_v54 = vadd.f32 %v1935_v50, %v2106_v36  ;;  %v811_v26 = vadd.f32 %v810_v1, %v748_v61 }
 0x14e   :  { %v782_v36 = vmul.f32 %v2391_v5, %v2391_v5  ;;  %v2420_v61 = vadd.f32 %v2098_v28, %v1935_v50 }
 0x14f   :  { %v711_v60 = vadd.f32 %v710_v31, %v2387_v44  ;;  %v848_v9 = vadd.f32 %v847_v51, %v780_v48  ;;  %2923 = vst [vmem:[#allocation34_spill] sm:$0xff] %v2404_v54  ;;  %v2414_v48 = vadd.f32 %v1935_v50, %v2110_v20  ;;  %v812_v31 = vadd.f32 %v811_v26, %v749_v62 }
 0x150   :  { %v682_v51 = vadd.f32 %v681_v41, %v680_v10  ;;  %v783_v10 = vmul.f32 %v2399_v25, %v2399_v25  ;;  %v751_v26 = vmul.f32 %v2306_v16, %v2306_v16  ;;  %v784_v62 = vmul.f32 %v2404_v54, %v2404_v54 }
 0x151   :  { %v712_v46 = vadd.f32 %v711_v60, %v2391_v5  ;;  %v849_v0 = vadd.f32 %v848_v9, %v781_v29  ;;  %v750_v60 = vmul.f32 %v2283_v58, %v2283_v58 }
 0x153   :  { %v713_v34 = vadd.f32 %v712_v46, %v2399_v25  ;;  %v850_v9 = vadd.f32 %v849_v0, %v782_v36  ;;  %v2427_v46 = vadd.f32 %v2108_v7, %v1935_v50  ;;  %v813_v29 = vadd.f32 %v812_v31, %v750_v60 }
 0x154   :  { %v752_v50 = vmul.f32 %v2323_v3, %v2323_v3  ;;  %v785_v60 = vmul.f32 %v2414_v48, %v2414_v48  ;;  %v753_v25 = vmul.f32 %v2343_v49, %v2343_v49 }
 0x155   :  { %v714_v40 = vadd.f32 %v713_v34, %v2404_v54  ;;  %v683_v34 = vrot.slane %v682_v51, 2  ;;  %v851_v41 = vadd.f32 %v850_v9, %v783_v10  ;;  %v814_v7 = vadd.f32 %v813_v29, %v751_v26 }
 0x156   :  { %v786_v29 = vmul.f32 %v2420_v61, %v2420_v61 }
 0x157   :  { %v715_v1 = vadd.f32 %v714_v40, %v2414_v48  ;;  %v684_v36 = vadd.f32 %v683_v34, %v682_v51  ;;  %v852_v31 = vadd.f32 %v851_v41, %v784_v62  ;;  %v754_v34 = vmul.f32 %v2369_v2, %v2369_v2 }
 0x159   :  { %v716_v20 = vadd.f32 %v715_v1, %v2420_v61  ;;  %v685_v5 = vrot.slane %v684_v36, 1  ;;  %v853_v54 = vadd.f32 %v852_v31, %v785_v60 }
 0x15b   :  { %v717_v28 = vadd.f32 %v716_v20, %v2427_v46  ;;  %v815_v20 = vadd.f32 %v814_v7, %v752_v50  ;;  %v854_v26 = vadd.f32 %v853_v54, %v786_v29  ;;  %v2924_v50 = vmov 0.0  }
 0x15d   :  { %v718_v0 = vrot.slane %v717_v28, 4  ;;  %v816_v10 = vadd.f32 %v815_v20, %v753_v25  ;;  %v2925_v25 = vmov 0.0|0.0   ;;  %v2927_v20 = vld [vmem:[#allocation6_spill] sm:$0xff] }
 0x15f   :  { %v719_v40 = vadd.f32 %v718_v0, %v717_v28  ;;  %v686_v28 = vadd.f32 %v685_v5, %v684_v36  ;;  %v817_v41 = vadd.f32 %v816_v10, %v754_v34  ;;  %v787_v0 = vmul.f32 %v2427_v46, %v2427_v46  ;;  %v2928_v10 = vld [vmem:[#allocation10_spill] sm:$0xff] }
 0x161   :  { %v720_v1 = vrot.slane %v719_v40, 2  ;;  %v855_v5 = vadd.f32 %v854_v26, %v787_v0 }
 0x163   :  { %v721_v44 = vadd.f32 %v720_v1, %v719_v40  ;;  %v856_v54 = vrot.slane %v855_v5, 4  ;;  %v2926_v1 = vld [vmem:[#allocation5_spill] sm:$0xff] }
 0x165   :  { %v722_v9 = vrot.slane %v721_v44, 1 }
 0x167   :  { %v723_v51 = vadd.f32 %v722_v9, %v721_v44  ;;  %v755_v44 = vmul.f32 %v2382_v33, %v2382_v33 }
 0x169   :  { %v881_v62 = vsel %vm880_vm2, %v723_v51, %v686_v28  ;;  %v818_v7 = vadd.f32 %v817_v41, %v755_v44  ;;  %v2929_v28 = vld [vmem:[#allocation12_spill] sm:$0xff] }
 0x16a   :  { %1557 = vmatmul.mubr.f32.vlgmr.msra.gmra.mrb[20].mxu1 %v881_v62 }
 0x16b   :  { %1620 = vmatpush3.bf16.msra.mxu1 %v1889_v35  ;;  %1591 = vmatprep.mubr.msk.f32.mxu1 %vm1711_vm1, %v2924_v50  ;;  %v819_v40 = vrot.slane %v818_v7, 4  ;;  %v857_v35 = vadd.f32 %v856_v54, %v855_v5  ;;  %v1713_v54 = vmov 1966171168  }
 0x16c   :  { %1621 = vmatprep.subr.bf16.mxu1 %v2925_v25 }
 0x16d   :  { %v820_v36 = vadd.f32 %v819_v40, %v818_v7  ;;  %v858_v31 = vrot.slane %v857_v35, 2  ;;  %v1051_v40 = vunpack.c.l.s4 %v1713_v54 }
 0x16f   :  { %1623 = vmatpush3.bf16.msra.mxu1 %v1900_v39  ;;  %v821_v60 = vrot.slane %v820_v36, 2  ;;  %v859_v39 = vadd.f32 %v858_v31, %v857_v35  ;;  %v1053_v35 = vlaneseq  ;;  %v1389_v31 = vld [vmem:[%s2856_s3] ss:$0 sm:$0xff]  ;;  %s1714_s3 = smov [#allocation2]  }
 0x170   :  { %1624 = vmatprep.subr.bf16.mxu1 %v2925_v25 }
 0x171   :  { %v822_v9 = vadd.f32 %v821_v60, %v820_v36  ;;  %v1054_v36 = vshrl.u32 %v1053_v35, 7  ;;  %v2933_v35 = vld [vmem:[#allocation11_spill] sm:$0xff] }
 0x173   :  { %1626 = vmatpush3.bf16.msra.mxu1 %v1910_v42  ;;  %v860_v42 = vrot.slane %v859_v39, 1  ;;  %v823_v29 = vrot.slane %v822_v9, 1 }
 0x174   :  { %1627 = vmatprep.subr.bf16.mxu1 %v2925_v25 }
 0x175   :  { %v824_v51 = vadd.f32 %v823_v29, %v822_v9 }
 0x177   :  { %1629 = vmatpush3.bf16.msra.mxu1 %v1920_v45  ;;  %v861_v45 = vadd.f32 %v860_v42, %v859_v39 }
 0x178   :  { %1630 = vmatprep.subr.bf16.mxu1 %v2925_v25 }
 0x179   :  { %v955_v34 = vsel %vm880_vm2, %v861_v45, %v824_v51 }
 0x17b   :  { %1632 = vmatpush3.bf16.msra.mxu1 %v2926_v1 }
 0x17c   :  { %1633 = vmatprep.subr.bf16.mxu1 %v2925_v25 }
 0x17f   :  { %1635 = vmatpush3.bf16.msra.mxu1 %v2927_v20  ;;  %v1390_v20 = vld [vmem:[%s2857_s4] ss:$0 sm:$0xff]  ;;  %s1312_s4 = sshll.u32 %s1714_s3, 4  ;;  %s2830_s4 = int_to_ptr.vmem [resolvable:$true] %s1312_s4 }
 0x180   :  { %1636 = vmatprep.subr.bf16.mxu1 %v2925_v25  ;;  %s1686_s21 = scalar_lea.vmem %s2830_s4, 8192  ;;  %p1691_p1 = scmp.lt.s32.totalorder %s2830_s4, %s2830_s4 }
 0x181   :  { %p1687_p0 = scmp.ne.s32.totalorder %s2830_s4, %s1686_s21  ;;  %p1692_p2 = scmp.lt.s32.totalorder %s1686_s21, %s1686_s21 }
 0x183   :  { %1638 = vmatpush3.bf16.msra.mxu1 %v2928_v10  ;;  %v1074_v10 = vsub.s32 0, %v1054_v36  ;;  %p1693_p3 = por %p1692_p2, %p1691_p1 }
 0x184   :  { %1639 = vmatprep.subr.bf16.mxu1 %v2925_v25  ;;  %v1052_v25 = vunpack.c.0.s8 %v1051_v40  ;;  %v2932_v40 = vld [vmem:[#allocation9_spill] sm:$0xff] }
 0x185   :  { %p1694_p4 = pnand %p1693_p3, %p1687_p0 }
 0x186   :  { %v1055_v1 = vsub.s32 %v1052_v25, %v1054_v36  ;;  %v2934_v36 = vld [vmem:[#allocation13_spill] sm:$0xff] }
 0x187   :  { %1641 = vmatpush3.bf16.msra.mxu1 %v2929_v28 }
 0x18a   :  { %1592 = vmatmul.mubr.f32.vlgmr.msra.gmra.mrb[22].mxu1 %v955_v34 }
 0x23d   :  { %v949_v26 = vpop.f32.mrb[20].mxu1 }
 0x23e   :  { %v1558_v62 = vpop.f32.mrb[21].mxu1  ;;  %v1027_v41 = vmul.f32 %v949_v26, %v949_v26 }
 0x25d   :  { %v1023_v0 = vpop.f32.mrb[22].mxu1 }
 0x25e   :  { %v1028_v50 = vsub.f32 %v1023_v0, %v1027_v41  ;;  %v1593_v44 = vpop.f32.mrb[23].mxu1 }
 0x25f   :  { %v2930_v44 = vld [vmem:[#allocation7_spill] sm:$0xff] }
 0x260   :  { %v1029_v5 = vmax.f32 %v1028_v50, 0.0 }
 0x262   :  { %v1030_v7 = vadd.f32 1e-06, %v1029_v5 }
 0x264   :  { %1684 = vrsqrt.f32 %v1030_v7  ;;  %v2931_v7 = vld [vmem:[#allocation8_spill] sm:$0xff] }
 0x26e   :  { %v1685_v60 = vpop.eup %1684 }
 0x26f   :  { %v1039_v39 = vmul.f32 %v1685_v60, %v1389_v31 }
 0x271   :  { %v1041_v9 = vmul.f32 %v1039_v39, %v949_v26  ;;  %v1056_v42 = vrot.slane %v1039_v39, %v1055_v1 }
 0x273   :  { %v1048_v29 = vsub.f32 %v1390_v20, %v1041_v9  ;;  %v1057_v45 = vcombine.high %v1056_v42, %v1056_v42  ;;  %v1064_v28 = vrot.slane %v1056_v42, %v1055_v1  ;;  %v2935_v20 = vld [vmem:[#allocation14_spill] sm:$0xff]  ;;  %v2936_v42 = vld [vmem:[#allocation15_spill] sm:$0xff] }
 0x275   :  { %v1071_v51 = vrot.slane %v1057_v45, %v1055_v1  ;;  %v1075_v34 = vrot.slane %v1064_v28, %v1074_v10  ;;  %v1153_v62 = vrot.slane %v1048_v29, %v1055_v1  ;;  %v2937_v45 = vld [vmem:[#allocation16_spill] sm:$0xff] }
 0x277   :  { %v2476_v41 = vrot.slane %v1071_v51, %v1074_v10  ;;  %v1154_v0 = vcombine.high %v1153_v62, %v1153_v62  ;;  %v1161_v50 = vrot.slane %v1153_v62, %v1055_v1  ;;  %v2479_v5 = vmul.f32 %v1075_v34, %v2930_v44  ;;  %v2938_v51 = vld [vmem:[#allocation17_spill] sm:$0xff]  ;;  %v2939_v44 = vld [vmem:[#allocation18_spill] sm:$0xff] }
 0x278   :  { %v2482_v54 = vmul.f32 %v1075_v34, %v2931_v7  ;;  %v2485_v26 = vmul.f32 %v1075_v34, %v2932_v40  ;;  %v2488_v25 = vmul.f32 %v1075_v34, %v2933_v35  ;;  %v2491_v31 = vmul.f32 %v1075_v34, %v2934_v36  ;;  %v2940_v40 = vld [vmem:[#allocation19_spill] sm:$0xff]  ;;  %v2943_v36 = vld [vmem:[#allocation21_spill] sm:$0xff] }
 0x279   :  { %v1168_v60 = vrot.slane %v1154_v0, %v1055_v1  ;;  %v2493_v39 = vrot.slane %v1161_v50, %v1074_v10  ;;  %v2496_v9 = vmul.f32 %v1075_v34, %v2935_v20  ;;  %v2499_v29 = vmul.f32 %v1075_v34, %v2936_v42  ;;  %v2942_v0 = vld [vmem:[#allocation20_spill] sm:$0xff] }
 0x27a   :  { %v2502_v28 = vmul.f32 %v1075_v34, %v2937_v45  ;;  %v2505_v62 = vmul.f32 %v1075_v34, %v2938_v51  ;;  %v2508_v7 = vmul.f32 %v1075_v34, %v2939_v44  ;;  %v2511_v35 = vmul.f32 %v1075_v34, %v2940_v40  ;;  %v2944_v45 = vld [vmem:[#allocation22_spill] sm:$0xff] }
 0x27b   :  { %v2513_v1 = vrot.slane %v1168_v60, %v1074_v10  ;;  %v2516_v50 = vmul.f32 %v1075_v34, %v2942_v0  ;;  %v2519_v20 = vmul.f32 %v1075_v34, %v2943_v36  ;;  %v2522_v42 = vmul.f32 %v1075_v34, %v2064_v18 }
 0x27c   :  { %v2525_v51 = vmul.f32 %v1075_v34, %v2944_v45  ;;  %v2528_v44 = vmul.f32 %v1075_v34, %v2094_v14  ;;  %v2531_v40 = vmul.f32 %v1075_v34, %v2103_v32  ;;  %v2534_v10 = vmul.f32 %v1075_v34, %v2118_v53 }
 0x27d   :  { %2941 = vst [vmem:[#allocation5_spill] sm:$0xff] %v2513_v1  ;;  %v2537_v60 = vmul.f32 %v1075_v34, %v2130_v30  ;;  %v2540_v0 = vmul.f32 %v1075_v34, %v2140_v15  ;;  %v2543_v18 = vmul.f32 %v1075_v34, %v2151_v17  ;;  %v2546_v36 = vmul.f32 %v1075_v34, %v2171_v63  ;;  %v2948_v1 = vld [vmem:[#allocation24_spill] sm:$0xff] }
 0x27e   :  { %v2549_v14 = vmul.f32 %v1075_v34, %v2199_v56  ;;  %v2552_v32 = vmul.f32 %v1075_v34, %v2215_v47  ;;  %v2555_v53 = vmul.f32 %v1075_v34, %v2234_v57  ;;  %v2558_v30 = vmul.f32 %v1075_v34, %v2257_v55  ;;  %v2946_v55 = vld [vmem:[#allocation23_spill] sm:$0xff] }
 0x27f   :  { %v2561_v15 = vmul.f32 %v1075_v34, %v2283_v58  ;;  %v2564_v17 = vmul.f32 %v1075_v34, %v2306_v16  ;;  %v2567_v63 = vmul.f32 %v1075_v34, %v2323_v3  ;;  %v2570_v56 = vmul.f32 %v1075_v34, %v2343_v49  ;;  %v2947_v58 = vld [vmem:[#allocation25_spill] sm:$0xff]  ;;  %v2950_v49 = vld [vmem:[#allocation26_spill] sm:$0xff] }
 0x280   :  { %v2573_v47 = vmul.f32 %v1075_v34, %v2369_v2  ;;  %v2576_v57 = vmul.f32 %v1075_v34, %v2382_v33  ;;  %v2580_v45 = vmul.f32 %v2476_v41, %v2946_v55  ;;  %v2584_v16 = vmul.f32 %v2476_v41, %v2947_v58  ;;  %v2951_v2 = vld [vmem:[#allocation27_spill] sm:$0xff]  ;;  %v2953_v34 = vld [vmem:[#allocation28_spill] sm:$0xff] }
 0x281   :  { %2945 = vst [vmem:[#allocation6_spill] sm:$0xff] %v2570_v56  ;;  %v2588_v3 = vmul.f32 %v2476_v41, %v2948_v1  ;;  %v2592_v56 = vmul.f32 %v2476_v41, %v2950_v49  ;;  %v2596_v33 = vmul.f32 %v2476_v41, %v2951_v2  ;;  %v2600_v55 = vmul.f32 %v2476_v41, %v2953_v34 }
 0x282   :  { %v2604_v58 = vmul.f32 %v2476_v41, %v2180_v59  ;;  %v2608_v1 = vmul.f32 %v2476_v41, %v2190_v19  ;;  %v2616_v2 = vmul.f32 %v2476_v41, %v2228_v8  ;;  %v2624_v59 = vmul.f32 %v2476_v41, %v2238_v12 }
 0x283   :  { %2949 = vst [vmem:[#allocation10_spill] sm:$0xff] %v2588_v3  ;;  %2952 = vst [vmem:[#allocation12_spill] sm:$0xff] %v2596_v33  ;;  %v2954_v3 = vld [vmem:[#allocation29_spill] sm:$0xff]  ;;  %v2955_v33 = vld [vmem:[#allocation30_spill] sm:$0xff]  ;;  %v2628_v19 = vmul.f32 %v2476_v41, %v2222_v13  ;;  %v2636_v8 = vmul.f32 %v2476_v41, %v2264_v21  ;;  %v2644_v12 = vmul.f32 %v2476_v41, %v2277_v22 }
 0x284   :  { %v2612_v49 = vmul.f32 %v2476_v41, %v2954_v3  ;;  %v2620_v34 = vmul.f32 %v2476_v41, %v2955_v33  ;;  %v2632_v3 = vmul.f32 %v2476_v41, %v2253_v4  ;;  %v2640_v33 = vmul.f32 %v2476_v41, %v2269_v27 }
 0x285   :  { %v2648_v13 = vmul.f32 %v2476_v41, %v2292_v43  ;;  %v2652_v4 = vmul.f32 %v2476_v41, %v2302_v24  ;;  %v2656_v21 = vmul.f32 %v2476_v41, %v2311_v23  ;;  %v2660_v27 = vmul.f32 %v2476_v41, %v2319_v38 }
 0x286   :  { %v2664_v22 = vmul.f32 %v2476_v41, %v2338_v6  ;;  %v2668_v43 = vmul.f32 %v2476_v41, %v2348_v37  ;;  %v2672_v24 = vmul.f32 %v2476_v41, %v2353_v11  ;;  %v2676_v23 = vmul.f32 %v2476_v41, %v2363_v52 }
 0x287   :  { %2956 = vst [vmem:[#allocation7_spill] sm:$0xff] %v2656_v21  ;;  %2957 = vst [vmem:[#allocation8_spill] sm:$0xff] %v2660_v27  ;;  %v2960_v21 = vld [vmem:[#allocation31_spill] sm:$0xff]  ;;  %v2961_v27 = vld [vmem:[#allocation32_spill] sm:$0xff]  ;;  %v2696_v52 = vmul.f32 %v2476_v41, %v2414_v48  ;;  %v1182_v48 = vadd.f32 %v2493_v39, %v2488_v25  ;;  %v1190_v25 = vadd.f32 %v2493_v39, %v2516_v50 }
 0x288   :  { %2958 = vst [vmem:[#allocation9_spill] sm:$0xff] %v2664_v22  ;;  %2959 = vst [vmem:[#allocation11_spill] sm:$0xff] %v2668_v43  ;;  %v2680_v38 = vmul.f32 %v2476_v41, %v2960_v21  ;;  %v2684_v6 = vmul.f32 %v2476_v41, %v2961_v27  ;;  %v2962_v22 = vld [vmem:[#allocation33_spill] sm:$0xff]  ;;  %v2964_v43 = vld [vmem:[#allocation34_spill] sm:$0xff]  ;;  %v2700_v21 = vmul.f32 %v2476_v41, %v2420_v61 }
 0x289   :  { %v2688_v37 = vmul.f32 %v2476_v41, %v2962_v22  ;;  %v2692_v11 = vmul.f32 %v2476_v41, %v2964_v43  ;;  %v2704_v27 = vmul.f32 %v2476_v41, %v2427_v46  ;;  %v1179_v22 = vadd.f32 %v2493_v39, %v2479_v5  ;;  %1246 = vst [vmem:[#allocation2 + $0x18] sm:$0xff] %v1182_v48 }
 0x28a   :  { %2965 = vst [vmem:[#allocation14_spill] sm:$0xff] %v2700_v21  ;;  %v1181_v43 = vadd.f32 %v2493_v39, %v2485_v26  ;;  %v1183_v61 = vadd.f32 %v2493_v39, %v2491_v31  ;;  %v1184_v21 = vadd.f32 %v2493_v39, %v2496_v9  ;;  %v1185_v46 = vadd.f32 %v2493_v39, %v2499_v29 }
 0x28b   :  { %2963 = vst [vmem:[#allocation13_spill] sm:$0xff] %v2688_v37  ;;  %v1180_v37 = vadd.f32 %v2493_v39, %v2482_v54  ;;  %v1186_v41 = vadd.f32 %v2493_v39, %v2502_v28  ;;  %v1187_v5 = vadd.f32 %v2493_v39, %v2505_v62  ;;  %v1188_v54 = vadd.f32 %v2493_v39, %v2508_v7 }
 0x28c   :  { %1243 = vst [vmem:[#allocation2] sm:$0xff] %v1179_v22  ;;  %v1189_v26 = vadd.f32 %v2493_v39, %v2511_v35  ;;  %v1191_v31 = vadd.f32 %v2493_v39, %v2519_v20  ;;  %v1192_v9 = vadd.f32 %v2493_v39, %v2522_v42  ;;  %1245 = vst [vmem:[#allocation2 + $0x10] sm:$0xff] %v1181_v43 }
 0x28d   :  { %1244 = vst [vmem:[#allocation2 + $0x8] sm:$0xff] %v1180_v37  ;;  %1247 = vst [vmem:[#allocation2 + $0x20] sm:$0xff] %v1183_v61  ;;  %v1193_v29 = vadd.f32 %v2493_v39, %v2525_v51  ;;  %v1194_v28 = vadd.f32 %v2493_v39, %v2528_v44  ;;  %v1195_v62 = vadd.f32 %v2493_v39, %v2531_v40 }
 0x28e   :  { %1248 = vst [vmem:[#allocation2 + $0x28] sm:$0xff] %v1184_v21  ;;  %v1196_v7 = vadd.f32 %v2493_v39, %v2534_v10  ;;  %1249 = vst [vmem:[#allocation2 + $0x30] sm:$0xff] %v1185_v46  ;;  %v1197_v35 = vadd.f32 %v2493_v39, %v2537_v60  ;;  %v1198_v50 = vadd.f32 %v2493_v39, %v2540_v0  ;;  %v2971_v48 = vld [vmem:[#allocation8_spill] sm:$0xff] }
 0x28f   :  { %1250 = vst [vmem:[#allocation2 + $0x38] sm:$0xff] %v1186_v41  ;;  %1251 = vst [vmem:[#allocation2 + $0x40] sm:$0xff] %v1187_v5  ;;  %v1199_v20 = vadd.f32 %v2493_v39, %v2543_v18  ;;  %v1200_v42 = vadd.f32 %v2493_v39, %v2546_v36  ;;  %v1201_v51 = vadd.f32 %v2493_v39, %v2549_v14  ;;  %v2966_v36 = vld [vmem:[#allocation6_spill] sm:$0xff]  ;;  %v2972_v61 = vld [vmem:[#allocation9_spill] sm:$0xff] }
 0x290   :  { %1252 = vst [vmem:[#allocation2 + $0x48] sm:$0xff] %v1188_v54  ;;  %1253 = vst [vmem:[#allocation2 + $0x50] sm:$0xff] %v1189_v26  ;;  %v1202_v44 = vadd.f32 %v2493_v39, %v2552_v32  ;;  %v1203_v40 = vadd.f32 %v2493_v39, %v2555_v53  ;;  %v1204_v10 = vadd.f32 %v2493_v39, %v2558_v30  ;;  %v2967_v30 = vld [vmem:[#allocation5_spill] sm:$0xff] }
 0x291   :  { %1254 = vst [vmem:[#allocation2 + $0x58] sm:$0xff] %v1190_v25  ;;  %1255 = vst [vmem:[#allocation2 + $0x60] sm:$0xff] %v1191_v31  ;;  %v1205_v60 = vadd.f32 %v2493_v39, %v2561_v15  ;;  %v1206_v0 = vadd.f32 %v2493_v39, %v2564_v17  ;;  %v1207_v18 = vadd.f32 %v2493_v39, %v2567_v63  ;;  %v2968_v63 = vld [vmem:[#allocation10_spill] sm:$0xff] }
 0x292   :  { %1256 = vst [vmem:[#allocation2 + $0x68] sm:$0xff] %v1192_v9  ;;  %1257 = vst [vmem:[#allocation2 + $0x70] sm:$0xff] %v1193_v29  ;;  %v1208_v14 = vadd.f32 %v2493_v39, %v2966_v36  ;;  %v1209_v32 = vadd.f32 %v2493_v39, %v2573_v47  ;;  %v1210_v53 = vadd.f32 %v2493_v39, %v2576_v57  ;;  %v2969_v47 = vld [vmem:[#allocation12_spill] sm:$0xff]  ;;  %v2974_v26 = vld [vmem:[#allocation13_spill] sm:$0xff] }
 0x293   :  { %1258 = vst [vmem:[#allocation2 + $0x78] sm:$0xff] %v1194_v28  ;;  %1259 = vst [vmem:[#allocation2 + $0x80] sm:$0xff] %v1195_v62  ;;  %v1211_v15 = vadd.f32 %v2967_v30, %v2580_v45  ;;  %v1212_v17 = vadd.f32 %v2967_v30, %v2584_v16  ;;  %v1213_v37 = vadd.f32 %v2967_v30, %v2968_v63 }
 0x294   :  { %1260 = vst [vmem:[#allocation2 + $0x88] sm:$0xff] %v1196_v7  ;;  %1261 = vst [vmem:[#allocation2 + $0x90] sm:$0xff] %v1197_v35  ;;  %v1214_v21 = vadd.f32 %v2967_v30, %v2592_v56  ;;  %v1215_v22 = vadd.f32 %v2967_v30, %v2969_v47  ;;  %v1216_v39 = vadd.f32 %v2967_v30, %v2600_v55 }
 0x295   :  { %1262 = vst [vmem:[#allocation2 + $0x98] sm:$0xff] %v1198_v50  ;;  %1263 = vst [vmem:[#allocation2 + $0xa0] sm:$0xff] %v1199_v20  ;;  %v1217_v57 = vadd.f32 %v2967_v30, %v2604_v58  ;;  %v1218_v45 = vadd.f32 %v2967_v30, %v2608_v1  ;;  %v1219_v16 = vadd.f32 %v2967_v30, %v2612_v49 }
 0x296   :  { %1264 = vst [vmem:[#allocation2 + $0xa8] sm:$0xff] %v1200_v42  ;;  %1265 = vst [vmem:[#allocation2 + $0xb0] sm:$0xff] %v1201_v51  ;;  %v1220_v56 = vadd.f32 %v2967_v30, %v2616_v2  ;;  %v1221_v55 = vadd.f32 %v2967_v30, %v2620_v34  ;;  %v1222_v43 = vadd.f32 %v2967_v30, %v2624_v59 }
 0x297   :  { %1266 = vst [vmem:[#allocation2 + $0xb8] sm:$0xff] %v1202_v44  ;;  %1267 = vst [vmem:[#allocation2 + $0xc0] sm:$0xff] %v1203_v40  ;;  %v1223_v58 = vadd.f32 %v2967_v30, %v2628_v19  ;;  %v1224_v1 = vadd.f32 %v2967_v30, %v2632_v3  ;;  %v1225_v49 = vadd.f32 %v2967_v30, %v2636_v8  ;;  %v2970_v3 = vld [vmem:[#allocation7_spill] sm:$0xff] }
 0x298   :  { %1268 = vst [vmem:[#allocation2 + $0xc8] sm:$0xff] %v1204_v10  ;;  %1269 = vst [vmem:[#allocation2 + $0xd0] sm:$0xff] %v1205_v60  ;;  %v1226_v2 = vadd.f32 %v2967_v30, %v2640_v33  ;;  %v1227_v34 = vadd.f32 %v2967_v30, %v2644_v12  ;;  %v1228_v59 = vadd.f32 %v2967_v30, %v2648_v13  ;;  %v2973_v13 = vld [vmem:[#allocation11_spill] sm:$0xff] }
 0x299   :  { %1270 = vst [vmem:[#allocation2 + $0xd8] sm:$0xff] %v1206_v0  ;;  %1271 = vst [vmem:[#allocation2 + $0xe0] sm:$0xff] %v1207_v18  ;;  %v1229_v19 = vadd.f32 %v2967_v30, %v2652_v4  ;;  %v1230_v8 = vadd.f32 %v2967_v30, %v2970_v3  ;;  %v1231_v33 = vadd.f32 %v2967_v30, %v2971_v48 }
 0x29a   :  { %1272 = vst [vmem:[#allocation2 + $0xe8] sm:$0xff] %v1208_v14  ;;  %1273 = vst [vmem:[#allocation2 + $0xf0] sm:$0xff] %v1209_v32  ;;  %v1232_v12 = vadd.f32 %v2967_v30, %v2972_v61  ;;  %v1233_v46 = vadd.f32 %v2967_v30, %v2973_v13  ;;  %v1234_v41 = vadd.f32 %v2967_v30, %v2672_v24 }
 0x29b   :  { %1274 = vst [vmem:[#allocation2 + $0xf8] sm:$0xff] %v1210_v53  ;;  %1275 = vst [vmem:[#allocation2 + $0x100] sm:$0xff] %v1211_v15  ;;  %v1235_v4 = vadd.f32 %v2967_v30, %v2676_v23  ;;  %v1236_v5 = vadd.f32 %v2967_v30, %v2680_v38  ;;  %v1237_v54 = vadd.f32 %v2967_v30, %v2684_v6  ;;  %v2975_v23 = vld [vmem:[#allocation14_spill] sm:$0xff] }
 0x29c   :  { %1276 = vst [vmem:[#allocation2 + $0x108] sm:$0xff] %v1212_v17  ;;  %1277 = vst [vmem:[#allocation2 + $0x110] sm:$0xff] %v1213_v37  ;;  %v1238_v25 = vadd.f32 %v2967_v30, %v2974_v26  ;;  %v1239_v31 = vadd.f32 %v2967_v30, %v2692_v11  ;;  %v1240_v24 = vadd.f32 %v2967_v30, %v2696_v52 }
 0x29d   :  { %1278 = vst [vmem:[#allocation2 + $0x118] sm:$0xff] %v1214_v21  ;;  %1279 = vst [vmem:[#allocation2 + $0x120] sm:$0xff] %v1215_v22  ;;  %v1241_v38 = vadd.f32 %v2967_v30, %v2975_v23  ;;  %v1242_v6 = vadd.f32 %v2967_v30, %v2704_v27 }
 0x29e   :  { %1280 = vst [vmem:[#allocation2 + $0x128] sm:$0xff] %v1216_v39  ;;  %1281 = vst [vmem:[#allocation2 + $0x130] sm:$0xff] %v1217_v57 }
 0x29f   :  { %1282 = vst [vmem:[#allocation2 + $0x138] sm:$0xff] %v1218_v45  ;;  %1283 = vst [vmem:[#allocation2 + $0x140] sm:$0xff] %v1219_v16 }
 0x2a0   :  { %1284 = vst [vmem:[#allocation2 + $0x148] sm:$0xff] %v1220_v56  ;;  %1285 = vst [vmem:[#allocation2 + $0x150] sm:$0xff] %v1221_v55 }
 0x2a1   :  { %1286 = vst [vmem:[#allocation2 + $0x158] sm:$0xff] %v1222_v43  ;;  %1287 = vst [vmem:[#allocation2 + $0x160] sm:$0xff] %v1223_v58 }
 0x2a2   :  { %1288 = vst [vmem:[#allocation2 + $0x168] sm:$0xff] %v1224_v1  ;;  %1289 = vst [vmem:[#allocation2 + $0x170] sm:$0xff] %v1225_v49 }
 0x2a3   :  { %1290 = vst [vmem:[#allocation2 + $0x178] sm:$0xff] %v1226_v2  ;;  %1291 = vst [vmem:[#allocation2 + $0x180] sm:$0xff] %v1227_v34 }
 0x2a4   :  { %1292 = vst [vmem:[#allocation2 + $0x188] sm:$0xff] %v1228_v59  ;;  %1293 = vst [vmem:[#allocation2 + $0x190] sm:$0xff] %v1229_v19 }
 0x2a5   :  { %1294 = vst [vmem:[#allocation2 + $0x198] sm:$0xff] %v1230_v8  ;;  %1295 = vst [vmem:[#allocation2 + $0x1a0] sm:$0xff] %v1231_v33 }
 0x2a6   :  { %1296 = vst [vmem:[#allocation2 + $0x1a8] sm:$0xff] %v1232_v12  ;;  %1297 = vst [vmem:[#allocation2 + $0x1b0] sm:$0xff] %v1233_v46 }
 0x2a7   :  { %1298 = vst [vmem:[#allocation2 + $0x1b8] sm:$0xff] %v1234_v41  ;;  %1299 = vst [vmem:[#allocation2 + $0x1c0] sm:$0xff] %v1235_v4 }
 0x2a8   :  { %1300 = vst [vmem:[#allocation2 + $0x1c8] sm:$0xff] %v1236_v5  ;;  %1301 = vst [vmem:[#allocation2 + $0x1d0] sm:$0xff] %v1237_v54 }
 0x2a9   :  { %1302 = vst [vmem:[#allocation2 + $0x1d8] sm:$0xff] %v1238_v25  ;;  %1303 = vst [vmem:[#allocation2 + $0x1e0] sm:$0xff] %v1239_v31 }
 0x2aa   :  { %1304 = vst [vmem:[#allocation2 + $0x1e8] sm:$0xff] %v1240_v24  ;;  %1305 = vst [vmem:[#allocation2 + $0x1f0] sm:$0xff] %v1241_v38 }
 0x2ab   :  { %1306 = vst [vmem:[#allocation2 + $0x1f8] sm:$0xff] %v1242_v6 }
 0x2ac   :  { %1697 = shalt.err (!%p1694_p4)
}
 0x2ad   :  { %s1698_s24 = scalar_lea.hbm %s2859_s6, 8192 }
 0x2ae   :  { %p1699_p5 = scmp.ne.s32.totalorder %s2859_s6, %s1698_s24  ;;  %p1702_p6 = scmp.lt.u32.totalorder %s1698_s24, %s2859_s6 }
 0x2b0   :  { %p1704_p7 = pnand %p1702_p6, %p1699_p5 }
 0x2b2   :  { %1707 = shalt.err (!%p1704_p7)
}
 0x2b3   :  { %s1715_s1 = smov 128   ;;  %s1716_s29 = smov 8  }
 0x2b4   :  { %1318 = dma.vmem_to_hbm [thread:$0]  %s2830_s4, 8192, %s2859_s6, [#allocation3], %s1715_s1, %s1715_s1, %s1716_s29  }
 0x2b5   :  { %1708 = dma.done.wait [#allocation3], 8192  }
 0x2b6   :  { %1709 = vsyncadd [#allocation3], 4294959104 }
 0x2b7   :  { %1322 = vsyncpa [#allocation3], 1 }

</bundles_post_ra>
